<compile_context>
chip_gen: v7x
topology: tpu7x:2x2x1
jax: 0.10.0
libtpu: 0.0.40
codegen_flags: <defaults>
</compile_context>

<pallas_src>
import functools

import jax
import jax.numpy as jnp
from jax.experimental import pallas as pl
from jax.experimental.pallas import tpu as pltpu

_EPS = 1e-8  # F.cosine_similarity default eps


def _contrastive_loss_kernel(o1_ref, o2_ref, lbl_ref, out_ref, acc_ref, *,
                             margin, tb, batch):
    j = pl.program_id(0)
    last = pl.num_programs(0) - 1

    @pl.when(j == 0)
    def _init():
        acc_ref[...] = jnp.zeros_like(acc_ref)

    x1 = o1_ref[...].astype(jnp.float32)          # (tb, D)
    x2 = o2_ref[...].astype(jnp.float32)          # (tb, D)
    lbl = lbl_ref[...].astype(jnp.float32)        # (tb, 1)

    dot = jnp.sum(x1 * x2, axis=1, keepdims=True)      # (tb, 1)
    s1 = jnp.sum(x1 * x1, axis=1, keepdims=True)       # (tb, 1)
    s2 = jnp.sum(x2 * x2, axis=1, keepdims=True)       # (tb, 1)

    # Modern PyTorch F.cosine_similarity: cos = dot / sqrt(max(s1*s2, eps^2)).
    # One EUP rsqrt per row instead of two.
    cos = dot * jax.lax.rsqrt(jnp.maximum(s1 * s2, _EPS * _EPS))

    hinge = jnp.maximum(margin - cos, 0.0)
    # Labels are binary {0,1}: a select is cheaper than the linear blend.
    loss = jnp.where(lbl >= 0.5, hinge * hinge, cos * cos)      # (tb, 1)

    if batch % tb == 0:
        # No ragged tile exists: skip the row mask entirely (trace time).
        acc_ref[...] += jnp.sum(loss)
    else:
        @pl.when(j != last)
        def _full_tile():
            acc_ref[...] += jnp.sum(loss)

        @pl.when(j == last)
        def _ragged_tile():
            # Mask (as a select, BEFORE the sum) the rows past the true batch;
            # their inputs are undefined DMA padding and may be NaN/Inf.
            row_ids = j * tb + jax.lax.broadcasted_iota(jnp.int32, loss.shape, 0)
            acc_ref[...] += jnp.sum(jnp.where(row_ids < batch, loss, 0.0))

    @pl.when(j == last)
    def _finalize():
        # Lane-dense (8, 128) output block; the partial sum is broadcast.
        out_ref[...] = jnp.broadcast_to(acc_ref[...], out_ref.shape)


def _vmem_capacity_bytes():
    try:
        return int(pltpu.get_tpu_info().vmem_capacity_bytes)
    except Exception:
        return 64 * 1024 * 1024    # conservative fallback (v7x per-TC VMEM)


def _choose_tile_rows(batch, feat, itemsize, budget_bytes):
    """Largest sublane-aligned row tile whose working set fits the budget."""
    per_row = (2 * 2 * feat * itemsize     # 2 inputs x 2 pipeline buffers
               + 3 * feat * 4              # in-kernel f32 temporaries (casts, products)
               + 2 * 128 * 4)              # (tb,1) label block, lane-padded, 2 buffers
    tb = max(budget_bytes // per_row, 8)
    tb = (tb // 8) * 8                     # sublane-aligned
    padded_batch = ((batch + 7) // 8) * 8
    return max(8, min(tb, padded_batch))   # never bigger than the padded batch


def contrastive_loss(output1, output2, label, margin=0.5, block_rows=None):
    """output1, output2: (B, D) embeddings (f32 or bf16); label: (B,) of {0,1}.

    Returns the scalar mean contrastive loss (float32)."""
    B, D = output1.shape
    label2d = label.reshape(B, 1).astype(jnp.float32)

    itemsize = max(jnp.dtype(output1.dtype).itemsize,
                   jnp.dtype(output2.dtype).itemsize)

    # Size blocks against the chip's real VMEM: ~48 MiB scoped limit on v7x
    # (64 MiB physical), ~96 MiB on v5e/v6e (128 MiB physical), minus headroom.
    cap = _vmem_capacity_bytes()
    vmem_limit = min(3 * cap // 4, 96 * 1024 * 1024)
    budget = max(vmem_limit - 8 * 1024 * 1024, 8 * 1024 * 1024)

    if block_rows is None:
        TB = _choose_tile_rows(B, D, itemsize, budget)
    else:
        padded_batch = ((B + 7) // 8) * 8
        TB = max(8, min((int(block_rows) // 8) * 8, padded_batch))

    num_tiles = pl.cdiv(B, TB)

    kernel = functools.partial(_contrastive_loss_kernel,
                               margin=float(margin), tb=TB, batch=B)

    partial = pl.pallas_call(
        kernel,
        out_shape=jax.ShapeDtypeStruct((8, 128), jnp.float32),
        grid=(num_tiles,),
        in_specs=[
            pl.BlockSpec((TB, D), lambda j: (j, 0)),
            pl.BlockSpec((TB, D), lambda j: (j, 0)),
            pl.BlockSpec((TB, 1), lambda j: (j, 0)),
        ],
        out_specs=pl.BlockSpec((8, 128), lambda j: (0, 0)),
        scratch_shapes=[pltpu.VMEM((1, 1), jnp.float32)],
        compiler_params=pltpu.CompilerParams(
            dimension_semantics=("arbitrary",),
            vmem_limit_bytes=int(vmem_limit),
        ),
    )(output1, output2, label2d)

    return partial[0, 0] / B


def contrastive_loss_ref(output1, output2, label, margin=0.5):
    """Pure-JAX reference mirroring the PyTorch forward (product eps clamp)."""
    x1 = output1.astype(jnp.float32)
    x2 = output2.astype(jnp.float32)
    dot = jnp.sum(x1 * x2, axis=1)
    s1 = jnp.sum(x1 * x1, axis=1)
    s2 = jnp.sum(x2 * x2, axis=1)
    cos = dot / jnp.sqrt(jnp.maximum(s1 * s2, _EPS * _EPS))
    lbl = label.astype(jnp.float32)
    loss = (lbl * jnp.square(jnp.maximum(margin - cos, 0.0))
            + (1.0 - lbl) * jnp.square(cos))
    return jnp.mean(loss)


if __name__ == "__main__":
    key = jax.random.PRNGKey(0)
    k1, k2, k3, k4, k5, k6, k7, k8, k9 = jax.random.split(key, 9)

    # Small embedding shapes consistent with a siamese head.
    B, D = 8, 128
    o1 = jax.random.normal(k1, (B, D), dtype=jnp.float32)
    o2 = jax.random.normal(k2, (B, D), dtype=jnp.float32)
    lbl = (jax.random.uniform(k3, (B,)) > 0.5).astype(jnp.float32)

    loss = contrastive_loss(o1, o2, lbl, margin=0.5)
    jax.block_until_ready(loss)
    ref = contrastive_loss_ref(o1, o2, lbl, margin=0.5)
    assert jnp.allclose(loss, ref, rtol=1e-5, atol=1e-6), (loss, ref)

    # Ragged batch (exercises the last-tile row mask).
    B2, D2 = 37, 96
    o1b = jax.random.normal(k4, (B2, D2), dtype=jnp.float32)
    o2b = jax.random.normal(k5, (B2, D2), dtype=jnp.float32)
    lblb = (jax.random.uniform(k6, (B2,)) > 0.5).astype(jnp.float32)

    loss2 = contrastive_loss(o1b, o2b, lblb, margin=0.5)
    jax.block_until_ready(loss2)
    ref2 = contrastive_loss_ref(o1b, o2b, lblb, margin=0.5)
    assert jnp.allclose(loss2, ref2, rtol=1e-5, atol=1e-6), (loss2, ref2)

    # Multi-tile accumulation with a forced small block (exercises the
    # pl.when init/accumulate/finalize path and the ragged last tile),
    # with bf16 inputs.
    B3, D3 = 40, 256
    o1c = jax.random.normal(k7, (B3, D3), dtype=jnp.bfloat16)
    o2c = jax.random.normal(k8, (B3, D3), dtype=jnp.bfloat16)
    lblc = (jax.random.uniform(k9, (B3,)) > 0.5).astype(jnp.float32)

    loss3 = contrastive_loss(o1c, o2c, lblc, margin=0.5, block_rows=16)
    jax.block_until_ready(loss3)
    ref3 = contrastive_loss_ref(o1c, o2c, lblc, margin=0.5)
    assert jnp.allclose(loss3, ref3, rtol=1e-5, atol=1e-6), (loss3, ref3)

    print("KERNEL_OK")
</pallas_src>

<mosaic_0001>
module attributes {stable_mosaic.version = 11 : i64} {
  func.func @_contrastive_loss_kernel(%arg0: i32, %arg1: memref<8x128xf32, #tpu.memory_space<vmem>>, %arg2: memref<8x128xf32, #tpu.memory_space<vmem>>, %arg3: memref<8x1xf32, #tpu.memory_space<vmem>>, %arg4: memref<8x128xf32, #tpu.memory_space<vmem>>, %arg5: memref<1x1xf32, #tpu.memory_space<vmem>>) attributes {dimension_semantics = [#tpu.dimension_semantics<arbitrary>], iteration_bounds = array<i64: 1>, scalar_prefetch = 0 : i64, scratch_operands = 1 : i64, tpu.core_type = #tpu.core_type<tc>, window_params = [{transform_indices = @transform_0, window_bounds = array<i64: 8, 128>}, {transform_indices = @transform_1, window_bounds = array<i64: 8, 128>}, {transform_indices = @transform_2, window_bounds = array<i64: 8, 1>}, {pipeline_mode = #tpu.pipeline_mode<synchronous>, transform_indices = @transform_3, window_bounds = array<i64: 8, 128>}]} {
    %c0_i32 = arith.constant 0 : i32
    %0 = arith.cmpi eq, %arg0, %c0_i32 : i32
    %1 = arith.extui %0 : i1 to i32
    %c0_i32_0 = arith.constant 0 : i32
    %2 = arith.cmpi ne, %1, %c0_i32_0 : i32
    scf.if %2 {
      %cst_19 = arith.constant 0.000000e+00 : f32
      %40 = vector.broadcast %cst_19 : f32 to vector<1x1xf32>
      %c0_20 = arith.constant 0 : index
      %c0_21 = arith.constant 0 : index
      %41 = vector.load %arg5[%c0_20, %c0_21] : memref<1x1xf32, #tpu.memory_space<vmem>>, vector<1x1xf32>
      tpu.vector_store %arg5[%c0_20, %c0_21], %40 {strides = array<i32>} : memref<1x1xf32, #tpu.memory_space<vmem>>, vector<1x1xf32>,
    } else {
    }
    %c0 = arith.constant 0 : index
    %c0_1 = arith.constant 0 : index
    %3 = vector.load %arg1[%c0, %c0_1] : memref<8x128xf32, #tpu.memory_space<vmem>>, vector<8x128xf32>
    %c0_2 = arith.constant 0 : index
    %c0_3 = arith.constant 0 : index
    %4 = vector.load %arg2[%c0_2, %c0_3] : memref<8x128xf32, #tpu.memory_space<vmem>>, vector<8x128xf32>
    %c0_4 = arith.constant 0 : index
    %c0_5 = arith.constant 0 : index
    %5 = vector.load %arg3[%c0_4, %c0_5] : memref<8x1xf32, #tpu.memory_space<vmem>>, vector<8x1xf32>
    %6 = arith.mulf %3, %4 : vector<8x128xf32>
    %cst = arith.constant dense<0.000000e+00> : vector<8xf32>
    %7 = vector.multi_reduction <add>, %6, %cst [1] : vector<8x128xf32> to vector<8xf32>
    %8 = vector.shape_cast %7 : vector<8xf32> to vector<8x1xf32>
    %9 = arith.mulf %3, %3 : vector<8x128xf32>
    %cst_6 = arith.constant dense<0.000000e+00> : vector<8xf32>
    %10 = vector.multi_reduction <add>, %9, %cst_6 [1] : vector<8x128xf32> to vector<8xf32>
    %11 = vector.shape_cast %10 : vector<8xf32> to vector<8x1xf32>
    %12 = arith.mulf %4, %4 : vector<8x128xf32>
    %cst_7 = arith.constant dense<0.000000e+00> : vector<8xf32>
    %13 = vector.multi_reduction <add>, %12, %cst_7 [1] : vector<8x128xf32> to vector<8xf32>
    %14 = vector.shape_cast %13 : vector<8xf32> to vector<8x1xf32>
    %15 = arith.mulf %11, %14 : vector<8x1xf32>
    %cst_8 = arith.constant 1.000000e-16 : f32
    %16 = vector.broadcast %cst_8 : f32 to vector<8x1xf32>
    %17 = arith.maximumf %15, %16 : vector<8x1xf32>
    %18 = math.rsqrt %17 : vector<8x1xf32>
    %19 = arith.mulf %8, %18 : vector<8x1xf32>
    %cst_9 = arith.constant 5.000000e-01 : f32
    %20 = vector.broadcast %cst_9 : f32 to vector<8x1xf32>
    %21 = arith.subf %20, %19 : vector<8x1xf32>
    %cst_10 = arith.constant 0.000000e+00 : f32
    %22 = vector.broadcast %cst_10 : f32 to vector<8x1xf32>
    %23 = arith.maximumf %21, %22 : vector<8x1xf32>
    %cst_11 = arith.constant 5.000000e-01 : f32
    %24 = vector.broadcast %cst_11 : f32 to vector<8x1xf32>
    %25 = arith.cmpf oge, %5, %24 : vector<8x1xf32>
    %26 = arith.mulf %23, %23 : vector<8x1xf32>
    %27 = arith.mulf %19, %19 : vector<8x1xf32>
    %28 = arith.select %25, %26, %27 : vector<8x1xi1>, vector<8x1xf32>
    %c0_12 = arith.constant 0 : index
    %c0_13 = arith.constant 0 : index
    %29 = vector.load %arg5[%c0_12, %c0_13] : memref<1x1xf32, #tpu.memory_space<vmem>>, vector<1x1xf32>
    %30 = vector.shape_cast %28 : vector<8x1xf32> to vector<1x8x1xf32>
    %cst_14 = arith.constant dense<0.000000e+00> : vector<1xf32>
    %31 = vector.multi_reduction <add>, %30, %cst_14 [1, 2] : vector<1x8x1xf32> to vector<1xf32>
    %32 = vector.shape_cast %31 : vector<1xf32> to vector<1x1x1xf32>
    %33 = vector.extract %32[0, 0, 0] : f32 from vector<1x1x1xf32>
    %34 = vector.broadcast %33 : f32 to vector<1x1xf32>
    %35 = arith.addf %29, %34 : vector<1x1xf32>
    %c0_15 = arith.constant 0 : index
    %c0_16 = arith.constant 0 : index
    %36 = vector.load %arg5[%c0_15, %c0_16] : memref<1x1xf32, #tpu.memory_space<vmem>>, vector<1x1xf32>
    tpu.vector_store %arg5[%c0_15, %c0_16], %35 {strides = array<i32>} : memref<1x1xf32, #tpu.memory_space<vmem>>, vector<1x1xf32>,
    %c0_i32_17 = arith.constant 0 : i32
    %37 = arith.cmpi eq, %arg0, %c0_i32_17 : i32
    %38 = arith.extui %37 : i1 to i32
    %c0_i32_18 = arith.constant 0 : i32
    %39 = arith.cmpi ne, %38, %c0_i32_18 : i32
    scf.if %39 {
      %c0_19 = arith.constant 0 : index
      %c0_20 = arith.constant 0 : index
      %40 = vector.load %arg5[%c0_19, %c0_20] : memref<1x1xf32, #tpu.memory_space<vmem>>, vector<1x1xf32>
      %41 = vector.shape_cast %40 : vector<1x1xf32> to vector<1x1xf32>
      %42 = vector.broadcast %41 : vector<1x1xf32> to vector<8x128xf32>
      %c0_21 = arith.constant 0 : index
      %c0_22 = arith.constant 0 : index
      %43 = vector.load %arg4[%c0_21, %c0_22] : memref<8x128xf32, #tpu.memory_space<vmem>>, vector<8x128xf32>
      tpu.vector_store %arg4[%c0_21, %c0_22], %42 {strides = array<i32>} : memref<8x128xf32, #tpu.memory_space<vmem>>, vector<8x128xf32>,
    } else {
    }
    return
  }
  func.func @transform_0(%arg0: i32) -> (i32, i32) {
    %c0_i32 = arith.constant 0 : i32
    %c0_i32_0 = arith.constant 0 : i32
    return %arg0, %c0_i32 : i32, i32
  }
  func.func @transform_1(%arg0: i32) -> (i32, i32) {
    %c0_i32 = arith.constant 0 : i32
    %c0_i32_0 = arith.constant 0 : i32
    return %arg0, %c0_i32 : i32, i32
  }
  func.func @transform_2(%arg0: i32) -> (i32, i32) {
    %c0_i32 = arith.constant 0 : i32
    %c0_i32_0 = arith.constant 0 : i32
    return %arg0, %c0_i32 : i32, i32
  }
  func.func @transform_3(%arg0: i32) -> (i32, i32) {
    %c0_i32 = arith.constant 0 : i32
    %c0_i32_0 = arith.constant 0 : i32
    %c0_i32_1 = arith.constant 0 : i32
    return %c0_i32, %c0_i32_0 : i32, i32
  }
}

</mosaic_0001>

<bundles_post_ra>
// kernel: tpu_custom_call.1
= control target key start
LH: loop header
LB: loop body
LE: loop exit
PB: predicated region body
PF: predicated region fallthrough
CT: control target
= control target key end

     0   :  { %8 = vsyncpa [#allocation4], 0  ;;  %s214_s0 = inlined_call_operand.vmem [shape: f32[8,128], index: 0, kind: input, shape index: {}]   ;;  %s215_s1 = inlined_call_operand.hbm [shape: f32[8,128], index: 1, kind: input, shape index: {}]   ;;  %s216_s2 = inlined_call_operand.vmem [shape: f32[8,1], index: 2, kind: input, shape index: {}]   ;;  %s217_s3 = inlined_call_operand.hbm [shape: f32[8,128], index: 3, kind: output, shape index: {}]  }
   0x1   :  { %9 = vsyncpa [#allocation5], 0  ;;  %s158_s12 = smov [#allocation3]   ;;  %s110_s16 = scalar_lea.hbm %s215_s1, 128 }
   0x2   :  { %s18_s13 = sshll.u32 %s158_s12, 4  ;;  %p111_p0 = scmp.ne.s32.totalorder %s215_s1, %s110_s16  ;;  %s19_s13 = int_to_ptr.vmem [resolvable:$true] %s18_s13 }
   0x3   :  { %p114_p1 = scmp.lt.u32.totalorder %s110_s16, %s215_s1 }
   0x5   :  { %p116_p2 = pnand %p114_p1, %p111_p0 }
   0x7   :  { %119 = shalt.err (!%p116_p2)
}
   0x8   :  { %s120_s21 = scalar_lea.vmem %s19_s13, 128  ;;  %p125_p4 = scmp.lt.s32.totalorder %s19_s13, %s19_s13 }
   0x9   :  { %p121_p3 = scmp.ne.s32.totalorder %s19_s13, %s120_s21  ;;  %p126_p5 = scmp.lt.s32.totalorder %s120_s21, %s120_s21 }
   0xb   :  { %p127_p6 = por %p126_p5, %p125_p4 }
   0xd   :  { %p128_p7 = pnand %p127_p6, %p121_p3 }
   0xf   :  { %131 = shalt.err (!%p128_p7)
}
  0x10   :  { %21 = dma.hbm_to_vmem [thread:$0]  %s215_s1, 128, %s19_s13, [#allocation4]  }
  0x11   :  { %154 = dma.done.wait [#allocation4], 128  }
  0x12   :  { %155 = vsyncadd [#allocation4], 4294967168  ;;  %v33_v0 = vld [vmem:[%s214_s0] sm:$0xff]  ;;  %vm56_vm1 = vcmask 7168   ;;  %vm31_vm2 = vcmask 0   ;;  %v159_v19 = vmov 0.0  }
  0x13   :  { %v34_v1 = vld [vmem:[#allocation3] sm:$0xff]  ;;  %v39_v2 = vmul.f32 %v33_v0, %v33_v0  ;;  %32 = vst.msk [vmem:[#allocation2] sm:$0x1] %vm31_vm2, %v159_v19  ;;  %v160_v20 = vmov 0  }
  0x14   :  { %v36_v3 = vmul.f32 %v34_v1, %v33_v0  ;;  %v42_v4 = vmul.f32 %v34_v1, %v34_v1  ;;  %v35_v13 = vld [vmem:[%s216_s2] sm:$0xff]  ;;  %107 = vset.pattern.permute.xlu0 %v160_v20  ;;  %s161_s2 = smov [#allocation6]  }
  0x15   :  { %40 = vadd.xlane.f32.xlu0 %v39_v2  ;;  %vm51_vm0 = vcmp.ge.f32.partialorder %v35_v13, 0.5  ;;  %s91_s27 = sshll.u32 %s161_s2, 4  ;;  %s92_s27 = int_to_ptr.vmem [resolvable:$true] %s91_s27 }
  0x16   :  { %37 = vadd.xlane.f32.xlu1 %v36_v3  ;;  %s132_s28 = scalar_lea.vmem %s92_s27, 128  ;;  %p137_p9 = scmp.lt.s32.totalorder %s92_s27, %s92_s27 }
  0x17   :  { %p133_p8 = scmp.ne.s32.totalorder %s92_s27, %s132_s28  ;;  %p138_p10 = scmp.lt.s32.totalorder %s132_s28, %s132_s28 }
  0x19   :  { %43 = vadd.xlane.f32.xlu0 %v42_v4  ;;  %p139_p11 = por %p138_p10, %p137_p9 }
  0x1a   :  { %v55_v28 = vld [vmem:[#allocation2] sm:$0x1] }
  0x1b   :  { %p140_p12 = pnand %p139_p11, %p133_p8 }
  0xa2   :  { %v41_v5 = vpop.xlane.xlu0 %40 }
  0xa3   :  { %v38_v9 = vpop.xlane.xlu1 %37 }
  0xa6   :  { %v44_v6 = vpop.xlane.xlu0 %43 }
  0xa7   :  { %v45_v7 = vmul.f32 %v44_v6, %v41_v5 }
  0xa9   :  { %v46_v8 = vmax.f32 %v45_v7, 1e-16 }
  0xab   :  { %108 = vrsqrt.f32 %v46_v8 }
  0xb5   :  { %v109_v10 = vpop.eup %108 }
  0xb6   :  { %v48_v11 = vmul.f32 %v109_v10, %v38_v9 }
  0xb8   :  { %v49_v12 = vsub.f32 0.5, %v48_v11  ;;  %v53_v16 = vmul.f32 %v48_v11, %v48_v11 }
  0xba   :  { %v50_v14 = vmax.f32 %v49_v12, 0.0 }
  0xbc   :  { %v52_v15 = vmul.f32 %v50_v14, %v50_v14 }
  0xbe   :  { %v54_v17 = vsel %vm51_vm0, %v52_v15, %v53_v16 }
  0xbf   :  { %v57_v18 = vsel %vm56_vm1, %v54_v17, 0.0 }
  0xc0   :  { %58 = vadd.xlane.f32.xlu1 %v57_v18 }
 0x14d   :  { %v59_v21 = vpop.xlane.xlu1 %58 }
 0x14e   :  { %v60_v22 = vrot.slane %v59_v21, 4 }
 0x150   :  { %v61_v23 = vadd.f32 %v60_v22, %v59_v21 }
 0x152   :  { %v62_v24 = vrot.slane %v61_v23, 2 }
 0x154   :  { %v63_v25 = vadd.f32 %v62_v24, %v61_v23 }
 0x156   :  { %v64_v26 = vrot.slane %v63_v25, 1 }
 0x158   :  { %v65_v27 = vadd.f32 %v64_v26, %v63_v25 }
 0x15a   :  { %101 = vpush %v65_v27 }
 0x18b   :  { %s102_s0 = spop %101 }
 0x18c   :  { %v67_v29 = vstv %s102_s0 }
 0x18d   :  { %v68_v30 = vadd.f32 %v67_v29, %v55_v28 }
 0x18f   :  { %70 = vst.msk [vmem:[#allocation2] sm:$0x1] %vm31_vm2, %v68_v30 }
 0x196   :  { %v100_v31 = vld [vmem:[#allocation2] ss:$0 sm:$0xff] }
 0x197   :  { %81 = vperm.xlu0 %107, %v100_v31  }
 0x216   :  { %v82_v32 = vpop.permute.xlu0 %81 }
 0x217   :  { %84 = vst [vmem:[#allocation6] sm:$0xff] %v82_v32 }
 0x218   :  { %143 = shalt.err (!%p140_p12)
}
 0x219   :  { %s144_s4 = scalar_lea.hbm %s217_s3, 128 }
 0x21a   :  { %p145_p13 = scmp.ne.s32.totalorder %s217_s3, %s144_s4  ;;  %p148_p0 = scmp.lt.u32.totalorder %s144_s4, %s217_s3 }
 0x21c   :  { %p150_p1 = pnand %p148_p0, %p145_p13 }
 0x21e   :  { %153 = shalt.err (!%p150_p1)
}
 0x21f   :  { %94 = dma.vmem_to_hbm [thread:$0]  %s92_s27, 128, %s217_s3, [#allocation5]  }
 0x220   :  { %156 = dma.done.wait [#allocation5], 128  }
 0x221   :  { %157 = vsyncadd [#allocation5], 4294967168 }
 0x222   :  { %98 = vsyncpa [#allocation4], 1 }
 0x223   :  { %99 = vsyncpa [#allocation5], 1 }

</bundles_post_ra>
